<compile_context>
chip_gen: v7x
topology: tpu7x:2x2x1
jax: 0.10.0
libtpu: 0.0.40
codegen_flags: <defaults>
</compile_context>

<pallas_src>
import functools

import jax
import jax.numpy as jnp
from jax.experimental import pallas as pl
from jax.experimental.pallas import tpu as pltpu


_LANE = 128
_MAX_HW_CHUNK = 256 * _LANE     # bounds the per-chunk slice unroll in the chunked kernel


def _round_down(x, m):
    return (x // m) * m


def _round_up(x, m):
    return ((x + m - 1) // m) * m


def _vmem_capacity_bytes():
    """Physical VMEM per TensorCore (static probe; conservative fallback)."""
    try:
        info = pltpu.get_tpu_info()
        for attr in ("vmem_capacity_bytes", "vmem_size_bytes", "vmem_bytes"):
            v = getattr(info, attr, None)
            if v:
                return int(v)
    except Exception:
        pass
    return 64 * 1024 * 1024      # assume the smallest (v7x-class) part if unknown


def _device_budgets(itemsize):
    """(vmem_limit, tile_hi, tile_lo) per TPU generation and input dtype."""
    phys = _vmem_capacity_bytes()
    if phys <= 64 * 1024 * 1024:          # v7x-class: 64 MiB VMEM, 3.2 TB/s, 2 TCs
        vmem_limit = 48 * 1024 * 1024
        tile_hi = 10 * 1024 * 1024
        tile_lo = 4 * 1024 * 1024
    else:                                 # v5e / v6e: 128 MiB VMEM
        vmem_limit = 64 * 1024 * 1024
        tile_hi = 14 * 1024 * 1024
        tile_lo = 2 * 1024 * 1024
    # Working set = 2x double-buffered input tile + up to one f32 temp of the
    # tile (sub-32-bit inputs get upcast for the f32-accumulated sum).
    denom = 2.0 + 4.0 / float(itemsize)
    cap = int(0.75 * vmem_limit / denom)
    tile_hi = max(256 * 1024, min(tile_hi, cap))
    tile_lo = min(tile_lo, tile_hi)
    return vmem_limit, tile_hi, tile_lo


def _store_lane_dense(out_ref, mx, av):
    """mx, av: (block_rows, 1) f32 columns -> one (2, block_rows) lane-dense store."""
    out_ref[...] = jnp.concatenate(
        [jnp.transpose(mx, (1, 0)), jnp.transpose(av, (1, 0))], axis=0
    ).astype(out_ref.dtype)


def _pool_kernel(x_ref, out_ref, *, inv_hw):
    """Single-pass kernel: the full H*W extent fits in one block."""
    x = x_ref[...]
    # Max in the native dtype (exact compare/select; no full-block f32 copy).
    mx = jnp.max(x, axis=-1, keepdims=True).astype(jnp.float32)           # (bR, 1)
    # Sum accumulates in f32 for accuracy.
    av = jnp.sum(x, axis=-1, keepdims=True, dtype=jnp.float32) * inv_hw   # (bR, 1)
    _store_lane_dense(out_ref, mx, av)


def _accum_lane_blocks(x_ref, mx_ref, sm_ref, n_slices, valid_to=None):
    """Fold (block_rows, n_slices*128) worth of x_ref into (block_rows, 128)
    lane-major running max/sum.  Pure VPU elementwise updates; no per-chunk
    cross-lane XLU reduce.  Only the (single) partial tail slice is masked."""
    m = mx_ref[...]
    s = sm_ref[...]
    for q in range(n_slices):
        xs = x_ref[:, q * _LANE:(q + 1) * _LANE]          # lane-aligned static slab
        if valid_to is not None and (q + 1) * _LANE > valid_to:
            lane = jax.lax.broadcasted_iota(jnp.int32, (1, _LANE), 1)
            valid = lane < (valid_to - q * _LANE)          # static threshold
            xs_m = jnp.where(valid, xs, jnp.array(-jnp.inf, dtype=xs.dtype))
            xs_s = jnp.where(valid, xs, jnp.zeros((), dtype=xs.dtype))
        else:
            xs_m = xs_s = xs
        m = jnp.maximum(m, xs_m.astype(jnp.float32))
        s = s + xs_s.astype(jnp.float32)
    mx_ref[...] = m
    sm_ref[...] = s


def _pool_kernel_chunked(x_ref, out_ref, mx_ref, sm_ref, *, hw, hw_chunk, inv_hw):
    """H*W is split over a trailing 'arbitrary' grid axis; running lane-major
    max/sum live in VMEM scratch and are reduced across lanes once at the end."""
    k = pl.program_id(1)
    last = pl.num_programs(1) - 1
    n_full = hw_chunk // _LANE
    rem = hw % hw_chunk                  # static tail length (0 if HW divides evenly)

    @pl.when(k == 0)
    def _():
        mx_ref[...] = jnp.full(mx_ref.shape, -jnp.inf, mx_ref.dtype)
        sm_ref[...] = jnp.zeros(sm_ref.shape, sm_ref.dtype)

    if rem:
        @pl.when(k < last)
        def _():
            _accum_lane_blocks(x_ref, mx_ref, sm_ref, n_full)

        @pl.when(k == last)
        def _():
            # Masking only on the final chunk; dead 128-lane slices past `rem`
            # are never even loaded.
            _accum_lane_blocks(x_ref, mx_ref, sm_ref,
                               (rem + _LANE - 1) // _LANE, valid_to=rem)
    else:
        _accum_lane_blocks(x_ref, mx_ref, sm_ref, n_full)

    @pl.when(k == last)
    def _():
        mx = jnp.max(mx_ref[...], axis=-1, keepdims=True)          # one XLU reduce
        av = jnp.sum(sm_ref[...], axis=-1, keepdims=True) * inv_hw
        _store_lane_dense(out_ref, mx, av)


def _plan_tiling(R, HW, itemsize, tile_hi, tile_lo):
    """Pick (block_rows, hw_chunk) for the (R, HW) row-wise reduction."""
    row_bytes = max(HW * itemsize, 1)
    full_hw = (tile_hi // row_bytes >= _LANE) or (R * row_bytes <= tile_hi)
    if full_hw:
        rows_hi = max(_LANE, _round_down(tile_hi // row_bytes, _LANE))
        rows_lo = max(_LANE, _round_down(tile_lo // row_bytes, _LANE))
        rows_tgt = max(_LANE, _round_up(pl.cdiv(R, 8), _LANE))   # ~8 pipeline steps
        block_rows = min(rows_hi, max(rows_lo, rows_tgt))
        if R >= 2 * _LANE:
            # Never collapse to a single block: the 'parallel' row axis must
            # feed both TensorCores on v7x and give the pipeline overlap.
            block_rows = min(block_rows, _round_up(pl.cdiv(R, 2), _LANE))
        elif block_rows >= R:
            block_rows = R                                        # single full block
        return block_rows, HW
    # Spatial extent too large for full-row tiles: also chunk HW
    # (reduction axis last in the grid).
    if R < _LANE:
        block_rows = R
    else:
        block_rows = min(512, max(_LANE, _round_down(pl.cdiv(R, 8), _LANE)))
    hw_chunk = max(_LANE, _round_down(tile_hi // (block_rows * itemsize), _LANE))
    hw_chunk = min(hw_chunk, _round_up(HW, _LANE), _MAX_HW_CHUNK)
    return block_rows, hw_chunk


def _build_pool_call(R, HW, dtype, block_rows, hw_chunk, vmem_limit):
    itemsize = jnp.dtype(dtype).itemsize
    num_row_blocks = pl.cdiv(R, block_rows)
    num_hw_chunks = pl.cdiv(HW, hw_chunk)
    inv_hw = 1.0 / float(HW)

    # Lane-dense output: row 0 = max, row 1 = avg.  Ragged last row block is
    # handled by OOB-read padding (garbage rows) + OOB-write masking (those
    # rows land only in lanes >= R, which are masked on store).
    out_shape = jax.ShapeDtypeStruct((2, R), dtype)

    if num_hw_chunks == 1:
        grid = (num_row_blocks,)
        kernel = functools.partial(_pool_kernel, inv_hw=inv_hw)
        in_specs = [pl.BlockSpec((block_rows, HW), lambda i: (i, 0))]
        out_specs = pl.BlockSpec((2, block_rows), lambda i: (0, i))
        scratch = []
        dims = ("parallel",)
    else:
        grid = (num_row_blocks, num_hw_chunks)
        kernel = functools.partial(_pool_kernel_chunked, hw=HW, hw_chunk=hw_chunk,
                                   inv_hw=inv_hw)
        in_specs = [pl.BlockSpec((block_rows, hw_chunk), lambda i, k: (i, k))]
        out_specs = pl.BlockSpec((2, block_rows), lambda i, k: (0, i))
        scratch = [pltpu.VMEM((block_rows, _LANE), jnp.float32),   # running max
                   pltpu.VMEM((block_rows, _LANE), jnp.float32)]   # running sum
        dims = ("parallel", "arbitrary")

    cost = pl.CostEstimate(
        flops=2 * R * HW,                       # one max-cmp + one add per element
        transcendentals=0,
        bytes_accessed=R * HW * itemsize + 2 * R * itemsize)

    return pl.pallas_call(
        kernel,
        out_shape=out_shape,
        grid_spec=pltpu.PrefetchScalarGridSpec(
            num_scalar_prefetch=0,
            grid=grid,
            in_specs=in_specs,
            out_specs=out_specs,
            scratch_shapes=scratch),
        compiler_params=pltpu.CompilerParams(
            dimension_semantics=dims,
            vmem_limit_bytes=vmem_limit),
        cost_estimate=cost,
    )


def adaptive_concat_pool2d(x, *, tile_hi_bytes=None, tile_lo_bytes=None):
    """x: (N, C, H, W) -> (N, 2*C, 1, 1); channel order = [max, avg] like PyTorch."""
    N, C, H, W = x.shape
    R, HW = N * C, H * W
    itemsize = jnp.dtype(x.dtype).itemsize

    # Tiny spatial extents (HW < 128) waste >= 7/8 of every vreg with HW on the
    # lane axis and are launch-latency bound: let XLA handle them directly.
    if HW < _LANE:
        mx = jnp.max(x, axis=(2, 3), keepdims=True)
        av = jnp.mean(x.astype(jnp.float32), axis=(2, 3), keepdims=True).astype(x.dtype)
        return jnp.concatenate([mx, av], axis=1)

    vmem_limit, tile_hi, tile_lo = _device_budgets(itemsize)
    if tile_hi_bytes is not None:
        tile_hi = tile_hi_bytes
    if tile_lo_bytes is not None:
        tile_lo = min(tile_lo_bytes, tile_hi)

    x2d = x.reshape(R, HW)                   # contiguous-dim reshape: free, no pad/copy

    block_rows, hw_chunk = _plan_tiling(R, HW, itemsize, tile_hi, tile_lo)
    pooled = _build_pool_call(R, HW, x.dtype, block_rows, hw_chunk, vmem_limit)(x2d)

    mx = pooled[0].reshape(N, C, 1, 1)
    av = pooled[1].reshape(N, C, 1, 1)
    return jnp.concatenate([mx, av], axis=1)


def _reference(x):
    x32 = x.astype(jnp.float32)
    return jnp.concatenate(
        [jnp.max(x32, axis=(2, 3), keepdims=True),
         jnp.mean(x32, axis=(2, 3), keepdims=True)], axis=1).astype(x.dtype)


if __name__ == "__main__":
    key = jax.random.PRNGKey(0)
    k1, k2, k3 = jax.random.split(key, 3)

    # 1) Primary: small shape implied by the module (batch=2, channels=4, spatial=16).
    x = jax.random.normal(key, (2, 4, 16, 16), dtype=jnp.float32)
    out = jax.block_until_ready(adaptive_concat_pool2d(x))
    assert out.shape == (2, 8, 1, 1), out.shape
    assert jnp.allclose(out, _reference(x), atol=1e-5, rtol=1e-5)

    # 2) Multi-block parallel row axis with a ragged (OOB-masked) last block.
    x2 = jax.random.normal(k1, (3, 100, 12, 12), dtype=jnp.float32)
    out2 = jax.block_until_ready(
        adaptive_concat_pool2d(x2, tile_hi_bytes=128 * 1024, tile_lo_bytes=64 * 1024))
    assert jnp.allclose(out2, _reference(x2), atol=1e-5, rtol=1e-4)

    # 3) HW-chunked path (lane-major running max/sum scratch, masked tail slice only).
    x3 = jax.random.normal(k2, (2, 3, 33, 33), dtype=jnp.float32)
    out3 = jax.block_until_ready(
        adaptive_concat_pool2d(x3, tile_hi_bytes=16 * 1024, tile_lo_bytes=8 * 1024))
    assert jnp.allclose(out3, _reference(x3), atol=1e-5, rtol=1e-4)

    # 4) Tiny-spatial bypass (HW < 128) falls back to plain XLA reductions.
    x4 = jax.random.normal(k3, (3, 100, 4, 4), dtype=jnp.float32)
    out4 = jax.block_until_ready(adaptive_concat_pool2d(x4))
    assert jnp.allclose(out4, _reference(x4), atol=1e-5, rtol=1e-4)

    # 5) bf16 input: native-dtype max, f32-accumulated mean.
    x5 = jax.random.normal(k1, (2, 4, 16, 16), dtype=jnp.float32).astype(jnp.bfloat16)
    out5 = jax.block_until_ready(adaptive_concat_pool2d(x5))
    assert jnp.allclose(out5.astype(jnp.float32),
                        _reference(x5).astype(jnp.float32), atol=2e-2, rtol=2e-2)

    print("KERNEL_OK")
</pallas_src>

<mosaic_0001>
module attributes {stable_mosaic.version = 11 : i64} {
  func.func @_pool_kernel(%arg0: i32, %arg1: memref<8x256xf32, #tpu.memory_space<vmem>>, %arg2: memref<2x8xf32, #tpu.memory_space<vmem>>) attributes {dimension_semantics = [#tpu.dimension_semantics<parallel>], iteration_bounds = array<i64: 1>, scalar_prefetch = 0 : i64, scratch_operands = 0 : i64, tpu.core_type = #tpu.core_type<tc>, window_params = [{transform_indices = @transform_0, window_bounds = array<i64: 8, 256>}, {transform_indices = @transform_1, window_bounds = array<i64: 2, 8>}]} {
    %c0 = arith.constant 0 : index
    %c0_0 = arith.constant 0 : index
    %0 = vector.load %arg1[%c0, %c0_0] : memref<8x256xf32, #tpu.memory_space<vmem>>, vector<8x256xf32>
    %cst = arith.constant dense<0xFF800000> : vector<8xf32>
    %1 = vector.multi_reduction <maximumf>, %0, %cst [1] : vector<8x256xf32> to vector<8xf32>
    %2 = vector.shape_cast %1 : vector<8xf32> to vector<8x1xf32>
    %cst_1 = arith.constant dense<0.000000e+00> : vector<8xf32>
    %3 = vector.multi_reduction <add>, %0, %cst_1 [1] : vector<8x256xf32> to vector<8xf32>
    %4 = vector.shape_cast %3 : vector<8xf32> to vector<8x1xf32>
    %cst_2 = arith.constant 3.906250e-03 : f32
    %5 = vector.broadcast %cst_2 : f32 to vector<8x1xf32>
    %6 = arith.mulf %4, %5 : vector<8x1xf32>
    %7 = tpu.transpose %2, [1, 0] : vector<8x1xf32> -> vector<1x8xf32>
    %8 = tpu.transpose %6, [1, 0] : vector<8x1xf32> -> vector<1x8xf32>
    %9 = tpu.concatenate %7, %8 in 0 : vector<1x8xf32>, vector<1x8xf32> -> vector<2x8xf32>
    %c0_3 = arith.constant 0 : index
    %c0_4 = arith.constant 0 : index
    %10 = vector.load %arg2[%c0_3, %c0_4] : memref<2x8xf32, #tpu.memory_space<vmem>>, vector<2x8xf32>
    tpu.vector_store %arg2[%c0_3, %c0_4], %9 {strides = array<i32>} : memref<2x8xf32, #tpu.memory_space<vmem>>, vector<2x8xf32>,
    return
  }
  func.func @transform_0(%arg0: i32) -> (i32, i32) {
    %c0_i32 = arith.constant 0 : i32
    %c0_i32_0 = arith.constant 0 : i32
    return %arg0, %c0_i32 : i32, i32
  }
  func.func @transform_1(%arg0: i32) -> (i32, i32) {
    %c0_i32 = arith.constant 0 : i32
    %c0_i32_0 = arith.constant 0 : i32
    return %c0_i32, %arg0 : i32, i32
  }
}

</mosaic_0001>

<bundles_post_ra>
// kernel: tpu_custom_call.1
= control target key start
LH: loop header
LB: loop body
LE: loop exit
PB: predicated region body
PF: predicated region fallthrough
CT: control target
= control target key end

     0   :  { %6 = vsyncpa [#allocation3], 0  ;;  %s203_s0 = inlined_call_operand.hbm [shape: f32[8,256], index: 0, kind: input, shape index: {}]   ;;  %s204_s1 = inlined_call_operand.hbm [shape: f32[2,8], index: 1, kind: output, shape index: {}]  }
   0x1   :  { %7 = vsyncpa [#allocation4], 0  ;;  %s167_s6 = smov [#allocation2]   ;;  %s119_s10 = scalar_lea.hbm %s203_s0, 256 }
   0x2   :  { %s14_s7 = sshll.u32 %s167_s6, 4  ;;  %p120_p0 = scmp.ne.s32.totalorder %s203_s0, %s119_s10  ;;  %s15_s7 = int_to_ptr.vmem [resolvable:$true] %s14_s7 }
   0x3   :  { %p123_p1 = scmp.lt.u32.totalorder %s119_s10, %s203_s0 }
   0x5   :  { %p125_p2 = pnand %p123_p1, %p120_p0 }
   0x7   :  { %128 = shalt.err (!%p125_p2)
}
   0x8   :  { %s129_s15 = scalar_lea.vmem %s15_s7, 256  ;;  %p134_p4 = scmp.lt.s32.totalorder %s15_s7, %s15_s7 }
   0x9   :  { %p130_p3 = scmp.ne.s32.totalorder %s15_s7, %s129_s15  ;;  %p135_p5 = scmp.lt.s32.totalorder %s129_s15, %s129_s15 }
   0xb   :  { %p136_p6 = por %p135_p5, %p134_p4 }
   0xd   :  { %p137_p7 = pnand %p136_p6, %p130_p3 }
   0xf   :  { %140 = shalt.err (!%p137_p7)
}
  0x10   :  { %17 = dma.hbm_to_vmem [thread:$0]  %s203_s0, 256, %s15_s7, [#allocation3]  }
  0x11   :  { %163 = dma.done.wait [#allocation3], 256  }
  0x12   :  { %164 = vsyncadd [#allocation3], 4294967040  ;;  %v21_v0 = vld [vmem:[#allocation2] sm:$0xff]  ;;  %v22_v1 = vld [vmem:[#allocation2 + $0x8] sm:$0xff]  ;;  %s168_s18 = smov [#allocation5]   ;;  %vm97_vm0 = vcmask 1040384  }
  0x13   :  { %v26_v2 = vadd.f32 %v22_v1, %v21_v0  ;;  %v23_v3 = vmax.f32 %v21_v0, %v22_v1  ;;  %s107_s19 = sshll.u32 %s168_s18, 4  ;;  %vm99_vm1 = vcmask 58368   ;;  %s108_s19 = int_to_ptr.vmem [resolvable:$true] %s107_s19 }
  0x14   :  { %s141_s0 = scalar_lea.vmem %s108_s19, 32  ;;  %p146_p9 = scmp.lt.s32.totalorder %s108_s19, %s108_s19 }
  0x15   :  { %27 = vadd.xlane.f32.xlu0 %v26_v2  ;;  %p142_p8 = scmp.ne.s32.totalorder %s108_s19, %s141_s0  ;;  %p147_p10 = scmp.lt.s32.totalorder %s141_s0, %s141_s0 }
  0x17   :  { %p148_p11 = por %p147_p10, %p146_p9 }
  0x19   :  { %24 = vmax.xlane.f32.xlu0 %v23_v3  ;;  %p149_p12 = pnand %p148_p11, %p142_p8 }
  0xa2   :  { %v28_v4 = vpop.xlane.xlu0 %27 }
  0xa3   :  { %v29_v5 = vmul.f32 0.00390625, %v28_v4 }
  0xa5   :  { %62 = vxpose.xlu1.b32.start.end [1/1] (short) (narrow) %v29_v5, 8 }
  0xa6   :  { %v25_v6 = vpop.xlane.xlu0 %24 }
  0xa9   :  { %30 = vxpose.xlu1.b32.start.end [1/1] (short) (narrow) %v25_v6, 8 }
 0x125   :  { %v78_v7 = vpop.trf.xlu1 }
 0x126   :  { %v95_v8 = vrot.slane %v78_v7, 7 }
 0x129   :  { %v46_v9 = vpop.trf.xlu1 }
 0x12a   :  { %v98_v10 = vsel %vm97_vm0, %v46_v9, %v95_v8 }
 0x12b   :  { %100 = vst.msk [vmem:[#allocation5] sm:$0x3] %vm99_vm1, %v98_v10 }
 0x12c   :  { %152 = shalt.err (!%p149_p12)
}
 0x12d   :  { %s153_s22 = scalar_lea.hbm %s204_s1, 32 }
 0x12e   :  { %p154_p13 = scmp.ne.s32.totalorder %s204_s1, %s153_s22  ;;  %p157_p0 = scmp.lt.u32.totalorder %s153_s22, %s204_s1 }
 0x130   :  { %p159_p1 = pnand %p157_p0, %p154_p13 }
 0x132   :  { %162 = shalt.err (!%p159_p1)
}
 0x133   :  { %110 = dma.vmem_to_hbm [thread:$0]  %s108_s19, 32, %s204_s1, [#allocation4]  }
 0x134   :  { %165 = dma.done.wait [#allocation4], 32  }
 0x135   :  { %166 = vsyncadd [#allocation4], 4294967264 }
 0x136   :  { %114 = vsyncpa [#allocation3], 1 }
 0x137   :  { %115 = vsyncpa [#allocation4], 1 }

</bundles_post_ra>
